<compile_context>
chip_gen: v5e
topology: v5e:2x2
jax: 0.10.0
libtpu: 0.0.40
codegen_flags: <defaults>
</compile_context>

<pallas_src>
import functools

import jax
import jax.numpy as jnp
from jax.experimental import pallas as pl
from jax.experimental.pallas import tpu as pltpu

_LANE = 128
_MAX_COLS = 4096  # lane-dense width cap (multiple of 128)


def _identity_kernel(x_ref, o_ref):
    # Pure pass-through: copy the current VMEM tile of the input to the output.
    o_ref[...] = x_ref[...]


def _sublane_multiple(dtype):
    # 8 for 32-bit, 16 for bf16/fp16, 32 for int8/fp8.
    itemsize = jnp.dtype(dtype).itemsize
    return max(8, 32 // itemsize)


@functools.lru_cache(maxsize=None)
def _vmem_limit_bytes():
    # Generation-aware scoped-VMEM limit: half of physical VMEM, capped at
    # 48 MiB.  v5e/v6e (128 MiB physical) -> 48 MiB; v7x (64 MiB) -> 32 MiB.
    cap = 64 * 1024 * 1024
    try:
        info = pltpu.get_tpu_info()
        cap = int(getattr(info, "vmem_capacity_bytes", cap))
    except Exception:
        pass
    return min(48 * 1024 * 1024, max(16 * 1024 * 1024, cap // 2))


def _target_tile_bytes():
    # Default double-buffering on input + output = 4 resident tile buffers;
    # keep 4 * tile comfortably under the VMEM limit.
    # v5e/v6e: 8 MiB tiles (32 MiB footprint); v7x: ~6 MiB tiles (~25 MiB).
    return min(8 * 1024 * 1024, _vmem_limit_bytes() // 5)


def _pick_tile_rows(nrows, ncols, itemsize, sub):
    target = _target_tile_bytes()
    rows_for_target = max(sub, (target // (ncols * itemsize)) // sub * sub)
    tile = min(nrows, rows_for_target)
    tile = max(sub, (tile // sub) * sub)
    if nrows % tile != 0:
        # Prefer a divisor of nrows (multiple of sub) within ~2x of the target
        # so the last grid step is not a masked partial block and per-step DMA
        # sizes stay uniform.  Bounded search; fall back to partial last block.
        lo = max(sub, tile // 2)
        cand, steps = tile, 0
        while cand >= lo and steps < 4096:
            if nrows % cand == 0:
                return cand
            cand -= sub
            steps += 1
    return tile


def _tiled_copy_2d(x2d, *, donate=False):
    nrows, ncols = x2d.shape
    dtype = x2d.dtype
    itemsize = jnp.dtype(dtype).itemsize
    sub = _sublane_multiple(dtype)
    tile_rows = _pick_tile_rows(nrows, ncols, itemsize, sub)
    grid = (pl.cdiv(nrows, tile_rows),)
    return pl.pallas_call(
        _identity_kernel,
        out_shape=jax.ShapeDtypeStruct((nrows, ncols), dtype),
        grid_spec=pltpu.PrefetchScalarGridSpec(
            num_scalar_prefetch=0,
            grid=grid,
            in_specs=[pl.BlockSpec((tile_rows, ncols), lambda i: (i, 0))],
            out_specs=pl.BlockSpec((tile_rows, ncols), lambda i: (i, 0)),
        ),
        compiler_params=pltpu.CompilerParams(
            dimension_semantics=("parallel",),
            vmem_limit_bytes=_vmem_limit_bytes(),
        ),
        input_output_aliases=({0: 0} if donate else {}),
    )(x2d)


def _single_block_copy(x2d):
    # The (8, 128) divisibility rule is waived when block_shape == array dims.
    shape = x2d.shape
    nd = len(shape)
    return pl.pallas_call(
        _identity_kernel,
        out_shape=jax.ShapeDtypeStruct(shape, x2d.dtype),
        grid_spec=pltpu.PrefetchScalarGridSpec(
            num_scalar_prefetch=0,
            grid=(1,),
            in_specs=[pl.BlockSpec(shape, lambda i, _nd=nd: (0,) * _nd)],
            out_specs=pl.BlockSpec(shape, lambda i, _nd=nd: (0,) * _nd),
        ),
        compiler_params=pltpu.CompilerParams(
            dimension_semantics=("arbitrary",),
            vmem_limit_bytes=_vmem_limit_bytes(),
        ),
    )(x2d)


def squeezenet_forward(x):
    """SqueezeNet.forward(x) == x.  Optimal implementation: no HBM round trip."""
    return x


def squeezenet_forward_pallas(x, *, donate=False):
    """Identity forward materialized through a Pallas copy kernel.

    Use only when a fresh (or donated-aliased) output buffer is required;
    otherwise call squeezenet_forward(), which is free.
    """
    orig_shape = x.shape
    dtype = x.dtype
    n = int(x.size)
    if n == 0:
        return x

    itemsize = jnp.dtype(dtype).itemsize
    sub = _sublane_multiple(dtype)

    # ---- Fast path: no-pad, lane-dense 2D tiling ---------------------------
    if n % _LANE == 0 and (n // _LANE) % sub == 0:
        # Widen the lane axis (kept a multiple of 128) while it divides n and
        # the row count stays a sublane-aligned, non-empty multiple.
        ncols = _LANE
        while (ncols * 2 <= _MAX_COLS
               and n % (ncols * 2) == 0
               and (n // (ncols * 2)) % sub == 0
               and (n // (ncols * 2)) >= sub):
            ncols *= 2
        nrows = n // ncols
        out2d = _tiled_copy_2d(x.reshape(nrows, ncols), donate=donate)
        return out2d.reshape(orig_shape)

    # ---- Unaligned fallbacks ------------------------------------------------
    vmem_limit = _vmem_limit_bytes()
    if 4 * n * itemsize <= vmem_limit:
        # Small unaligned: one full-array block (in + out double-buffered fits VMEM).
        out = _single_block_copy(x.reshape(1, n))
        return out.reshape(orig_shape)

    # Large unaligned: tiled copy of the lane-aligned prefix + tiny tail block.
    # TODO(synk): a manual pl.ANY + make_async_copy chunked loop would avoid the
    # flatten/concatenate passes for this (rare) path.
    chunk = _LANE * sub
    flat = x.reshape(n)
    n_main = (n // chunk) * chunk
    main = _tiled_copy_2d(flat[:n_main].reshape(n_main // _LANE, _LANE))
    tail = _single_block_copy(flat[n_main:].reshape(1, n - n_main))
    return jnp.concatenate([main.reshape(-1), tail.reshape(-1)]).reshape(orig_shape)


if __name__ == "__main__":
    key = jax.random.PRNGKey(0)
    # Small NCHW input consistent with an image-model forward signature.
    x = jax.random.normal(key, (2, 4, 16, 16), dtype=jnp.float32)

    # Optimal path: identity forward is a no-op.
    y_ref = squeezenet_forward(x)
    assert y_ref is x

    # Kernel path: run the Pallas copy once and verify bitwise identity.
    y = squeezenet_forward_pallas(x)
    jax.block_until_ready(y)

    assert y.shape == x.shape, (y.shape, x.shape)
    assert y.dtype == x.dtype, (y.dtype, x.dtype)
    assert bool(jnp.array_equal(y, x)), "identity forward mismatch"

    print("KERNEL_OK")
</pallas_src>

<mosaic_0001>
module attributes {stable_mosaic.version = 11 : i64} {
  func.func @_identity_kernel(%arg0: i32, %arg1: memref<8x256xf32, #tpu.memory_space<vmem>>, %arg2: memref<8x256xf32, #tpu.memory_space<vmem>>) attributes {dimension_semantics = [#tpu.dimension_semantics<parallel>], iteration_bounds = array<i64: 1>, scalar_prefetch = 0 : i64, scratch_operands = 0 : i64, tpu.core_type = #tpu.core_type<tc>, window_params = [{transform_indices = @transform_0, window_bounds = array<i64: 8, 256>}, {transform_indices = @transform_1, window_bounds = array<i64: 8, 256>}]} {
    %c0 = arith.constant 0 : index
    %c0_0 = arith.constant 0 : index
    %0 = vector.load %arg1[%c0, %c0_0] : memref<8x256xf32, #tpu.memory_space<vmem>>, vector<8x256xf32>
    %c0_1 = arith.constant 0 : index
    %c0_2 = arith.constant 0 : index
    %1 = vector.load %arg2[%c0_1, %c0_2] : memref<8x256xf32, #tpu.memory_space<vmem>>, vector<8x256xf32>
    tpu.vector_store %arg2[%c0_1, %c0_2], %0 {strides = array<i32>} : memref<8x256xf32, #tpu.memory_space<vmem>>, vector<8x256xf32>,
    return
  }
  func.func @transform_0(%arg0: i32) -> (i32, i32) {
    %c0_i32 = arith.constant 0 : i32
    %c0_i32_0 = arith.constant 0 : i32
    return %arg0, %c0_i32 : i32, i32
  }
  func.func @transform_1(%arg0: i32) -> (i32, i32) {
    %c0_i32 = arith.constant 0 : i32
    %c0_i32_0 = arith.constant 0 : i32
    return %arg0, %c0_i32 : i32, i32
  }
}

</mosaic_0001>

<bundles_post_ra>
// kernel: tpu_custom_call.1
= control target key start
LH: loop header
LB: loop body
LE: loop exit
PB: predicated region body
PF: predicated region fallthrough
CT: control target
= control target key end

     0   :  { %6 = vsyncpa [#allocation3], 0  ;;  %s116_s0 = inlined_call_operand.hbm [shape: f32[8,256], index: 0, kind: input, shape index: {}]   ;;  %s117_s1 = inlined_call_operand.hbm [shape: f32[8,256], index: 1, kind: output, shape index: {}]  }
   0x1   :  { %7 = vsyncpa [#allocation4], 0  ;;  %s13_s8 = sshll.u32 %s116_s0, 4  ;;  %s98_s9 = smov [#allocation2]   ;;  %s14_s8 = int_to_ptr.hbm [resolvable:$true] %s13_s8 }
   0x2   :  { %s15_s10 = sshll.u32 %s98_s9, 4  ;;  %s16_s10 = int_to_ptr.vmem [resolvable:$true] %s15_s10 }
   0x3   :  { %18 = dma.hbm_to_vmem [thread:$0]  %s14_s8, 256, %s16_s10, [#allocation3]  }
   0x4   :  { %94 = dma.done.wait [#allocation3], 256  }
   0x5   :  { %95 = vsyncadd [#allocation3], 4294967040  ;;  %s99_s11 = smov [#allocation5]   ;;  %s34_s15 = sshll.u32 %s117_s1, 4  ;;  %v23_v0 = vld [vmem:[#allocation2] sm:$0xff]  ;;  %v24_v1 = vld [vmem:[#allocation2 + $0x8] sm:$0xff]  ;;  %s35_s15 = int_to_ptr.hbm [resolvable:$true] %s34_s15 }
   0x6   :  { %s32_s12 = sshll.u32 %s99_s11, 4  ;;  %25 = vst [vmem:[#allocation5] sm:$0xff] %v23_v0  ;;  %s33_s12 = int_to_ptr.vmem [resolvable:$true] %s32_s12 }
   0x7   :  { %26 = vst [vmem:[#allocation5 + $0x8] sm:$0xff] %v24_v1 }
   0x8   :  { %37 = dma.vmem_to_hbm [thread:$0]  %s33_s12, 256, %s35_s15, [#allocation4]  }
   0x9   :  { %96 = dma.done.wait [#allocation4], 256  }
   0xa   :  { %97 = vsyncadd [#allocation4], 4294967040 }
   0xb   :  { %42 = vsyncpa [#allocation3], 1 }
   0xc   :  { %43 = vsyncpa [#allocation4], 1 }

</bundles_post_ra>
